<compile_context>
chip_gen: v5e
topology: v5e:2x2
jax: 0.10.0
libtpu: 0.0.40
codegen_flags: <defaults>
</compile_context>

<pallas_src>
import jax
import jax.numpy as jnp
from jax.experimental import pallas as pl
from jax.experimental.pallas import tpu as pltpu


def _fused_attention_kernel(xk_ref, xv_ref, ak_ref, bka_ref, wvt_ref, wot_ref,
                            bvo_ref, expand_ref, o_ref):
    # One batch per grid step; all heads handled together (lane-dense D).
    xk = xk_ref[0]                       # (S_k, D)
    xv = xv_ref[0]                       # (S_k, D)

    # Folded key-alignment scores per head: ka[j, hh] = wa . (Wk_h xk_j + bk_h).
    ka = jnp.dot(xk, ak_ref[...], preferred_element_type=jnp.float32) + bka_ref[...]   # (S_k, h)

    # Bahdanau score is wa.q_i + wa.k_j: the query term is constant along the
    # softmax axis and cancels exactly, so one softmax over keys per head is the
    # attention distribution shared by every query row.
    m = jnp.max(ka, axis=0, keepdims=True)            # (1, h)
    e = jnp.exp(ka - m)                               # (S_k, h)
    denom = jnp.sum(e, axis=0, keepdims=True)         # (1, h)
    p = e * pl.reciprocal(denom, approx=False)        # (S_k, h), reciprocal on EUP

    # Value projection for all heads at once (weights pre-transposed: no .T here).
    # bv is folded into bvo in the wrapper, so no bias add here.
    v = jnp.dot(xv, wvt_ref[...], preferred_element_type=jnp.float32)                  # (S_k, D)

    # Expand each head's weight across its d_k lanes, then reduce over keys.
    pe = jnp.dot(p, expand_ref[...], preferred_element_type=jnp.float32)               # (S_k, D)
    ctx_row = jnp.sum(pe * v, axis=0, keepdims=True)                                   # (1, D)

    # Fused output Linear; bias is (bv @ Wo^T + bo).  Broadcast the shared
    # context row over the query axis.
    out_row = jnp.dot(ctx_row, wot_ref[...], preferred_element_type=jnp.float32) + bvo_ref[...]  # (1, D)
    o_ref[0] = jnp.broadcast_to(out_row, (o_ref.shape[1], o_ref.shape[2]))


def self_attention_forward(xq, xk, xv, params, h):
    """Pallas forward of SelfAttention. xq/xk/xv: (B, S, d_model), float32."""
    B, S_q, D = xq.shape
    assert D % h == 0
    d_k = D // h
    Wq, bq, Wk, bk, Wv, bv, Wo, bo, wa = params
    # Wq/bq (and xq beyond its shape) are mathematically unused: the query-side
    # score term is constant along the softmax axis and cancels exactly.
    del Wq, bq

    wa_vec = wa.reshape(d_k)

    # Fold the alignment vector into the key projection:
    #   ka[b, j, hh] = wa . (Wk_h xk[b, j] + bk_h) = xk[b, j] @ ak[:, hh] + bka[hh]
    ak = jnp.einsum('hkd,k->dh', Wk.reshape(h, d_k, D), wa_vec)                 # (D, h)
    bka = jnp.einsum('hk,k->h', bk.reshape(h, d_k), wa_vec).reshape(1, h)       # (1, h)

    # Pre-transpose weights to (in, out) layout so the kernel needs no transpose.
    wvt = Wv.T                                                                  # (D, D)
    wot = Wo.T                                                                  # (D, D)
    # Softmax weights sum to 1 per head, so bv passes through the attention
    # average unchanged; fold it through Wo into the output bias.
    bvo = (bv @ Wo.T + bo).reshape(1, D)                                        # (1, D)

    # Per-head lane expansion matrix: (S, h) weights -> (S, D) with each head's
    # weight repeated across its d_k lanes.
    expand = jnp.repeat(jnp.eye(h, dtype=jnp.float32), d_k, axis=1)             # (h, D)

    rep = lambda b: (0, 0)
    out = pl.pallas_call(
        _fused_attention_kernel,
        out_shape=jax.ShapeDtypeStruct((B, S_q, D), jnp.float32),
        grid=(B,),
        in_specs=[pl.BlockSpec((1, xk.shape[1], D), lambda b: (b, 0, 0)),  # xk
                  pl.BlockSpec((1, xv.shape[1], D), lambda b: (b, 0, 0)),  # xv
                  pl.BlockSpec((D, h), rep),                               # ak
                  pl.BlockSpec((1, h), rep),                               # bka
                  pl.BlockSpec((D, D), rep),                               # Wv^T
                  pl.BlockSpec((D, D), rep),                               # Wo^T
                  pl.BlockSpec((1, D), rep),                               # bvo
                  pl.BlockSpec((h, D), rep)],                              # expand
        out_specs=pl.BlockSpec((1, S_q, D), lambda b: (b, 0, 0)),
        compiler_params=pltpu.CompilerParams(
            dimension_semantics=("parallel",)),   # batch axis splits across v7x TCs
    )(xk, xv, ak, bka, wvt, wot, bvo, expand)
    return out


def _reference(xq, xk, xv, params, h):
    """Pure-JAX reference mirroring the PyTorch forward exactly (eval mode)."""
    B, S, D = xq.shape
    d_k = D // h
    Wq, bq, Wk, bk, Wv, bv, Wo, bo, wa = params

    def proj(x, W, b):
        y = x @ W.T + b                                       # (B, S, D)
        return y.reshape(B, S, h, d_k).transpose(0, 2, 1, 3)  # (B, h, S, d_k)

    q = proj(xq, Wq, bq)
    k = proj(xk, Wk, bk)
    v = proj(xv, Wv, bv)

    qa = jnp.einsum('bhsd,d->bhs', q, wa.reshape(-1))
    ka = jnp.einsum('bhsd,d->bhs', k, wa.reshape(-1))
    scores = qa[..., :, None] + ka[..., None, :]              # (B, h, S, S)
    p = jax.nn.softmax(scores, axis=-1)
    ctx = jnp.einsum('bhij,bhjd->bhid', p, v)
    x = ctx.transpose(0, 2, 1, 3).reshape(B, S, D)
    return x @ Wo.T + bo


if __name__ == "__main__":
    B, S, d_model, h = 2, 8, 32, 2
    d_k = d_model // h

    key = jax.random.PRNGKey(0)
    keys = jax.random.split(key, 12)

    # Deterministic parameter init (PyTorch Linear shapes: weight (out, in), bias (out,)).
    scale = 0.1
    Wq = scale * jax.random.normal(keys[0], (d_model, d_model), jnp.float32)
    bq = scale * jax.random.normal(keys[1], (d_model,), jnp.float32)
    Wk = scale * jax.random.normal(keys[2], (d_model, d_model), jnp.float32)
    bk = scale * jax.random.normal(keys[3], (d_model,), jnp.float32)
    Wv = scale * jax.random.normal(keys[4], (d_model, d_model), jnp.float32)
    bv = scale * jax.random.normal(keys[5], (d_model,), jnp.float32)
    Wo = scale * jax.random.normal(keys[6], (d_model, d_model), jnp.float32)
    bo = scale * jax.random.normal(keys[7], (d_model,), jnp.float32)
    wa = scale * jax.random.normal(keys[8], (1, d_k), jnp.float32)  # alignment_layer weight
    params = (Wq, bq, Wk, bk, Wv, bv, Wo, bo, wa)

    xq = jax.random.normal(keys[9], (B, S, d_model), jnp.float32)
    xk = jax.random.normal(keys[10], (B, S, d_model), jnp.float32)
    xv = jax.random.normal(keys[11], (B, S, d_model), jnp.float32)

    out = self_attention_forward(xq, xk, xv, params, h)
    out = jax.block_until_ready(out)

    ref = _reference(xq, xk, xv, params, h)
    assert out.shape == (B, S, d_model)
    assert jnp.allclose(out, ref, rtol=1e-5, atol=1e-5), "Pallas output mismatch vs reference"

    print("KERNEL_OK")
</pallas_src>

<mosaic_0001>
module attributes {stable_mosaic.version = 11 : i64} {
  func.func @_fused_attention_kernel(%arg0: i32, %arg1: memref<1x8x32xf32, #tpu.memory_space<vmem>>, %arg2: memref<1x8x32xf32, #tpu.memory_space<vmem>>, %arg3: memref<32x2xf32, #tpu.memory_space<vmem>>, %arg4: memref<1x2xf32, #tpu.memory_space<vmem>>, %arg5: memref<32x32xf32, #tpu.memory_space<vmem>>, %arg6: memref<32x32xf32, #tpu.memory_space<vmem>>, %arg7: memref<1x32xf32, #tpu.memory_space<vmem>>, %arg8: memref<2x32xf32, #tpu.memory_space<vmem>>, %arg9: memref<1x8x32xf32, #tpu.memory_space<vmem>>) attributes {dimension_semantics = [#tpu.dimension_semantics<parallel>], iteration_bounds = array<i64: 2>, scalar_prefetch = 0 : i64, scratch_operands = 0 : i64, tpu.core_type = #tpu.core_type<tc>, window_params = [{transform_indices = @transform_0, window_bounds = array<i64: 1, 8, 32>}, {transform_indices = @transform_1, window_bounds = array<i64: 1, 8, 32>}, {pipeline_mode = #tpu.pipeline_mode<synchronous>, transform_indices = @transform_2, window_bounds = array<i64: 32, 2>}, {pipeline_mode = #tpu.pipeline_mode<synchronous>, transform_indices = @transform_3, window_bounds = array<i64: 1, 2>}, {pipeline_mode = #tpu.pipeline_mode<synchronous>, transform_indices = @transform_4, window_bounds = array<i64: 32, 32>}, {pipeline_mode = #tpu.pipeline_mode<synchronous>, transform_indices = @transform_5, window_bounds = array<i64: 32, 32>}, {pipeline_mode = #tpu.pipeline_mode<synchronous>, transform_indices = @transform_6, window_bounds = array<i64: 1, 32>}, {pipeline_mode = #tpu.pipeline_mode<synchronous>, transform_indices = @transform_7, window_bounds = array<i64: 2, 32>}, {transform_indices = @transform_8, window_bounds = array<i64: 1, 8, 32>}]} {
    %c0 = arith.constant 0 : index
    %c0_0 = arith.constant 0 : index
    %c0_1 = arith.constant 0 : index
    %0 = vector.load %arg1[%c0, %c0_0, %c0_1] : memref<1x8x32xf32, #tpu.memory_space<vmem>>, vector<1x8x32xf32>
    %1 = vector.shape_cast %0 : vector<1x8x32xf32> to vector<8x32xf32>
    %c0_2 = arith.constant 0 : index
    %c0_3 = arith.constant 0 : index
    %c0_4 = arith.constant 0 : index
    %2 = vector.load %arg2[%c0_2, %c0_3, %c0_4] : memref<1x8x32xf32, #tpu.memory_space<vmem>>, vector<1x8x32xf32>
    %3 = vector.shape_cast %2 : vector<1x8x32xf32> to vector<8x32xf32>
    %c0_5 = arith.constant 0 : index
    %c0_6 = arith.constant 0 : index
    %4 = vector.load %arg3[%c0_5, %c0_6] : memref<32x2xf32, #tpu.memory_space<vmem>>, vector<32x2xf32>
    %cst = arith.constant dense<0.000000e+00> : vector<8x2xf32>
    %5 = tpu.matmul %1, %4, %cst {dimension_numbers = #tpu.dot_dimension_numbers<[1], [0], [0], [1], [0, 0, 1, 1], [], []>} : vector<8x32xf32>, vector<32x2xf32>, vector<8x2xf32> -> vector<8x2xf32>
    %c0_7 = arith.constant 0 : index
    %c0_8 = arith.constant 0 : index
    %6 = vector.load %arg4[%c0_7, %c0_8] : memref<1x2xf32, #tpu.memory_space<vmem>>, vector<1x2xf32>
    %7 = vector.broadcast %6 : vector<1x2xf32> to vector<8x2xf32>
    %8 = arith.addf %5, %7 : vector<8x2xf32>
    %cst_9 = arith.constant dense<0xFF800000> : vector<2xf32>
    %9 = vector.multi_reduction <maximumf>, %8, %cst_9 [0] : vector<8x2xf32> to vector<2xf32>
    %10 = vector.shape_cast %9 : vector<2xf32> to vector<1x2xf32>
    %11 = vector.broadcast %10 : vector<1x2xf32> to vector<8x2xf32>
    %12 = arith.subf %8, %11 : vector<8x2xf32>
    %13 = math.exp %12 : vector<8x2xf32>
    %cst_10 = arith.constant dense<0.000000e+00> : vector<2xf32>
    %14 = vector.multi_reduction <add>, %13, %cst_10 [0] : vector<8x2xf32> to vector<2xf32>
    %15 = vector.shape_cast %14 : vector<2xf32> to vector<1x2xf32>
    %16 = tpu.reciprocal %15 : vector<1x2xf32> -> vector<1x2xf32>
    %17 = vector.broadcast %16 : vector<1x2xf32> to vector<8x2xf32>
    %18 = arith.mulf %13, %17 : vector<8x2xf32>
    %c0_11 = arith.constant 0 : index
    %c0_12 = arith.constant 0 : index
    %19 = vector.load %arg5[%c0_11, %c0_12] : memref<32x32xf32, #tpu.memory_space<vmem>>, vector<32x32xf32>
    %cst_13 = arith.constant dense<0.000000e+00> : vector<8x32xf32>
    %20 = tpu.matmul %3, %19, %cst_13 {dimension_numbers = #tpu.dot_dimension_numbers<[1], [0], [0], [1], [0, 0, 1, 1], [], []>} : vector<8x32xf32>, vector<32x32xf32>, vector<8x32xf32> -> vector<8x32xf32>
    %c0_14 = arith.constant 0 : index
    %c0_15 = arith.constant 0 : index
    %21 = vector.load %arg8[%c0_14, %c0_15] : memref<2x32xf32, #tpu.memory_space<vmem>>, vector<2x32xf32>
    %cst_16 = arith.constant dense<0.000000e+00> : vector<8x32xf32>
    %22 = tpu.matmul %18, %21, %cst_16 {dimension_numbers = #tpu.dot_dimension_numbers<[1], [0], [0], [1], [0, 0, 1, 1], [], []>} : vector<8x2xf32>, vector<2x32xf32>, vector<8x32xf32> -> vector<8x32xf32>
    %23 = arith.mulf %22, %20 : vector<8x32xf32>
    %cst_17 = arith.constant dense<0.000000e+00> : vector<32xf32>
    %24 = vector.multi_reduction <add>, %23, %cst_17 [0] : vector<8x32xf32> to vector<32xf32>
    %25 = vector.shape_cast %24 : vector<32xf32> to vector<1x32xf32>
    %c0_18 = arith.constant 0 : index
    %c0_19 = arith.constant 0 : index
    %26 = vector.load %arg6[%c0_18, %c0_19] : memref<32x32xf32, #tpu.memory_space<vmem>>, vector<32x32xf32>
    %cst_20 = arith.constant dense<0.000000e+00> : vector<1x32xf32>
    %27 = tpu.matmul %25, %26, %cst_20 {dimension_numbers = #tpu.dot_dimension_numbers<[1], [0], [0], [1], [0, 0, 1, 1], [], []>} : vector<1x32xf32>, vector<32x32xf32>, vector<1x32xf32> -> vector<1x32xf32>
    %c0_21 = arith.constant 0 : index
    %c0_22 = arith.constant 0 : index
    %28 = vector.load %arg7[%c0_21, %c0_22] : memref<1x32xf32, #tpu.memory_space<vmem>>, vector<1x32xf32>
    %29 = arith.addf %27, %28 : vector<1x32xf32>
    %30 = vector.shape_cast %29 : vector<1x32xf32> to vector<1x32xf32>
    %31 = vector.broadcast %30 : vector<1x32xf32> to vector<8x32xf32>
    %c0_23 = arith.constant 0 : index
    %c0_24 = arith.constant 0 : index
    %c0_25 = arith.constant 0 : index
    %32 = vector.load %arg9[%c0_23, %c0_24, %c0_25] : memref<1x8x32xf32, #tpu.memory_space<vmem>>, vector<1x8x32xf32>
    %33 = vector.shape_cast %32 : vector<1x8x32xf32> to vector<8x32xf32>
    %34 = vector.shape_cast %31 : vector<8x32xf32> to vector<1x8x32xf32>
    tpu.vector_store %arg9[%c0_23, %c0_24, %c0_25], %34 {strides = array<i32>} : memref<1x8x32xf32, #tpu.memory_space<vmem>>, vector<1x8x32xf32>,
    return
  }
  func.func @transform_0(%arg0: i32) -> (i32, i32, i32) {
    %c0_i32 = arith.constant 0 : i32
    %c0_i32_0 = arith.constant 0 : i32
    %c0_i32_1 = arith.constant 0 : i32
    return %arg0, %c0_i32, %c0_i32_0 : i32, i32, i32
  }
  func.func @transform_1(%arg0: i32) -> (i32, i32, i32) {
    %c0_i32 = arith.constant 0 : i32
    %c0_i32_0 = arith.constant 0 : i32
    %c0_i32_1 = arith.constant 0 : i32
    return %arg0, %c0_i32, %c0_i32_0 : i32, i32, i32
  }
  func.func @transform_2(%arg0: i32) -> (i32, i32) {
    %c0_i32 = arith.constant 0 : i32
    %c0_i32_0 = arith.constant 0 : i32
    %c0_i32_1 = arith.constant 0 : i32
    return %c0_i32, %c0_i32_0 : i32, i32
  }
  func.func @transform_3(%arg0: i32) -> (i32, i32) {
    %c0_i32 = arith.constant 0 : i32
    %c0_i32_0 = arith.constant 0 : i32
    %c0_i32_1 = arith.constant 0 : i32
    return %c0_i32, %c0_i32_0 : i32, i32
  }
  func.func @transform_4(%arg0: i32) -> (i32, i32) {
    %c0_i32 = arith.constant 0 : i32
    %c0_i32_0 = arith.constant 0 : i32
    %c0_i32_1 = arith.constant 0 : i32
    return %c0_i32, %c0_i32_0 : i32, i32
  }
  func.func @transform_5(%arg0: i32) -> (i32, i32) {
    %c0_i32 = arith.constant 0 : i32
    %c0_i32_0 = arith.constant 0 : i32
    %c0_i32_1 = arith.constant 0 : i32
    return %c0_i32, %c0_i32_0 : i32, i32
  }
  func.func @transform_6(%arg0: i32) -> (i32, i32) {
    %c0_i32 = arith.constant 0 : i32
    %c0_i32_0 = arith.constant 0 : i32
    %c0_i32_1 = arith.constant 0 : i32
    return %c0_i32, %c0_i32_0 : i32, i32
  }
  func.func @transform_7(%arg0: i32) -> (i32, i32) {
    %c0_i32 = arith.constant 0 : i32
    %c0_i32_0 = arith.constant 0 : i32
    %c0_i32_1 = arith.constant 0 : i32
    return %c0_i32, %c0_i32_0 : i32, i32
  }
  func.func @transform_8(%arg0: i32) -> (i32, i32, i32) {
    %c0_i32 = arith.constant 0 : i32
    %c0_i32_0 = arith.constant 0 : i32
    %c0_i32_1 = arith.constant 0 : i32
    return %arg0, %c0_i32, %c0_i32_0 : i32, i32, i32
  }
}

</mosaic_0001>

<bundles_post_ra>
// kernel: tpu_custom_call.1
= control target key start
LH: loop header
LB: loop body
LE: loop exit
PB: predicated region body
PF: predicated region fallthrough
CT: control target
= control target key end

     0   :  { %s1174_s0 = inlined_call_operand.hbm [shape: f32[2,8,32], index: 0, kind: input, shape index: {}]   ;;  %s1175_s1 = inlined_call_operand.hbm [shape: f32[2,8,32], index: 1, kind: input, shape index: {}]   ;;  %s1176_s2 = inlined_call_operand.vmem [shape: f32[32,2], index: 2, kind: input, shape index: {}]   ;;  %s1177_s3 = inlined_call_operand.vmem [shape: f32[1,2], index: 3, kind: input, shape index: {}]   ;;  %s1178_s4 = inlined_call_operand.vmem [shape: f32[32,32], index: 4, kind: input, shape index: {}]   ;;  %s1179_s5 = inlined_call_operand.hbm [shape: f32[32,32], index: 5, kind: input, shape index: {}]   ;;  %s1180_s6 = inlined_call_operand.vmem [shape: f32[1,32], index: 6, kind: input, shape index: {}]   ;;  %s1181_s7 = inlined_call_operand.vmem [shape: f32[2,32], index: 7, kind: input, shape index: {}]   ;;  %s1182_s8 = inlined_call_operand.hbm [shape: f32[2,8,32], index: 8, kind: output, shape index: {}]  }
   0x1   :  { %1189 = sst [smem:[#allocation19_spill]] %s1179_s5 }
   0x2   :  { %13 = vsyncpa [#allocation3], 0 }
   0x3   :  { %15 = vsyncpa [#allocation3 + $0x1], 0 }
   0x4   :  { %16 = vsyncpa [#allocation6], 0 }
   0x5   :  { %18 = vsyncpa [#allocation6 + $0x1], 0 }
   0x6   :  { %19 = vsyncpa [#allocation4], 0 }
   0x7   :  { %21 = vsyncpa [#allocation4 + $0x1], 0  ;;  %s961_s27 = smov 0   ;;  %s963_s28 = smov 0  }
   0x8   :  { %s965_s29 = smov 0   ;;  %s967_s30 = smov 0  }
   0x9 LB: > { %1190 = sst [smem:[#allocation13_spill]] %s899_s27  ;;  %s985_s12 = sadd.s32 4294967295, %s911_s30   ;;  %s911_s30 = sphi %s967_s30, %s1207_s30   ;;  %s907_s29 = sphi %s965_s29, %s1209_s29   ;;  %s903_s28 = sphi %s963_s28, %s1211_s28   ;;  %s899_s27 = sphi %s961_s27, %s1210_s27  }
   0xa   : > { %1191 = sst [smem:[#allocation14_spill]] %s907_s29  ;;  %p657_p0 = scmp.ge.s32.totalorder %s911_s30, 1 }
   0xb   : > { %1192 = sst [smem:[#allocation15_spill]] %s911_s30  ;;  %p48_p1 = scmp.eq.s32.totalorder %s985_s12, 0 }
   0xc   : > { %s1193_s5 = sld [smem:[#allocation19_spill]]  ;;  %p236_p2 = scmp.lt.s32.totalorder %s911_s30, 3 }
   0xd   : > { %s913_s14 = smov [#allocation7]   ;;  %s914_s16 = smov 128  }
   0xe   : > { %p990_p3 = pnand %p657_p0, %p236_p2  ;;  %s258_s15 = sshll.u32 %s913_s14, 4  ;;  %s259_s15 = int_to_ptr.vmem [resolvable:$true] %s258_s15 }
   0xf   : > { %s915_s17 = smov 8   ;;  %s656_s18 = sadd.s32 4294967294, %s911_s30  }
  0x10   : > { %p688_p4 = pneg %p990_p3  ;;  %s1001_s19 = sadd.s32 1, %s911_s30  }
  0x11   : > { %1195 = sst [smem:[#allocation16_spill]] %s1001_s19  ;;  %s34_s20 = sadd.s32 1, %s907_s29 }
  0x12   : > { %s256_s11 = sshll.u32 %s1193_s5, 4  ;;  %p689_p6 = pnand %p688_p4, %p48_p1  ;;  %s257_s11 = int_to_ptr.hbm [resolvable:$true] %s256_s11 }
  0x13   : > { %s31_s21 = ssub.s32 %s911_s30, %s1001_s19  ;;  %p41_p7 = scmp.ne.s32.totalorder %s907_s29, %s903_s28 }
  0x14   : > { %691 = dma.hbm_to_vmem [thread:$0]  (!%p689_p6), %s257_s11, 512, %s259_s15, [#allocation6], %s914_s16, %s914_s16, %s915_s17  }
  0x15   : > { %p32_p8 = scmp.eq.s32.totalorder %s31_s21, 0  ;;  %p42_p9 = scmp.eq.s32.totalorder %s911_s30, 0 }
  0x16   : > { %p47_p10 = scmp.ne.s32.totalorder %s903_s28, %s899_s27  ;;  %p223_p11 = scmp.eq.s32.totalorder %s985_s12, 1 }
  0x17   : > { %s1013_s22 = scalar_select %p32_p8, %s907_s29, %s34_s20  }
  0x18   : > { %p1015_p12 = por %p42_p9, %p41_p7  ;;  %p1021_p13 = por %p48_p1, %p47_p10 }
  0x19   : > { %1196 = sst [smem:[#allocation17_spill]] %s1013_s22  ;;  %p1025_p0 = por %p223_p11, %p41_p7 }
  0x1a   : > { %p229_p2 = scmp.eq.s32.totalorder %s656_s18, 1  ;;  %p704_p4 = scmp.lt.s32.totalorder %s911_s30, 2 }
  0x1b   : > { %s278_s26 = sand.u32 1, %s907_s29   ;;  %s661_s11 = sshll.u32 %s911_s30, 3 }
  0x1c   : > { %p1031_p6 = por %p229_p2, %p47_p10  ;;  %s660_s10 = sshll.u32 %s278_s26, 3 }
  0x1d   : > { %s286_s16 = scalar_lea.hbm %s1174_s0, %s661_s11  ;;  %s282_s20 = scalar_lea.vmem [#allocation2], %s660_s10 }
  0x1e   : > { %s1200_s9 = scalar_select %p1031_p6, 1, 0 }
  0x1f   : > { %s288_s17 = sshll.u32 %s286_s16, 4  ;;  %s290_s21 = sshll.u32 %s282_s20, 4  ;;  %s289_s17 = int_to_ptr.hbm [resolvable:$true] %s288_s17  ;;  %s291_s21 = int_to_ptr.vmem [resolvable:$true] %s290_s21 }
  0x20   : > { %1201 = sst [smem:[#allocation18_spill]] %s1200_s9  ;;  %p1041_p7 = pnand %p704_p4, %p1015_p12 }
  0x21   : > { %s305_s29 = scalar_lea.hbm %s1175_s1, %s661_s11  ;;  %s297_s19 = sand.u32 1, %s911_s30  }
  0x22   : > { %s279_s9 = scalar_lea.sflag [#allocation3], %s278_s26  ;;  %s777_s14 = sshra.s32 %s289_s17, 4  ;;  %s778_s14 = int_to_ptr.hbm [resolvable:$true] %s777_s14 }
  0x23   : > { %s779_s15 = scalar_lea.hbm %s778_s14, 8  ;;  %p781_p9 = pneg %p1041_p7 }
  0x24   : > { %p780_p8 = scmp.ne.s32.totalorder %s778_s14, %s779_s15  ;;  %s784_s20 = scalar_lea.hbm %s1174_s0, 16 }
  0x25   : > { %p785_p12 = scmp.lt.s32.totalorder %s778_s14, %s1174_s0  ;;  %p786_p2 = scmp.lt.s32.totalorder %s784_s20, %s779_s15 }
  0x26   : > { %p782_p10 = pnand %p781_p9, %p780_p8 }
  0x27   : > { %p787_p4 = por %p786_p2, %p785_p12 }
  0x28   : > { %p783_p11 = pneg %p782_p10 }
  0x2a   : > { %p788_p5 = pnand %p787_p4, %p783_p11 }
  0x2c   : > { %791 = shalt.err (!%p788_p5)
}
  0x2d   : > { %695 = dma.hbm_to_vmem [thread:$0]  (!%p1041_p7), %s289_s17, 128, %s291_s21, %s279_s9  }
  0x2e   : > { %s307_s26 = sshll.u32 %s305_s29, 4  ;;  %s301_s11 = scalar_lea.vmem [#allocation5], %s660_s10  ;;  %s308_s26 = int_to_ptr.hbm [resolvable:$true] %s307_s26 }
  0x2f   : > { %s309_s30 = sshll.u32 %s301_s11, 4  ;;  %s298_s27 = scalar_lea.sflag [#allocation6], %s297_s19  ;;  %s310_s30 = int_to_ptr.vmem [resolvable:$true] %s309_s30 }
  0x30   : > { %s807_s23 = sshra.s32 %s308_s26, 4  ;;  %s814_s20 = scalar_lea.hbm %s1175_s1, 16  ;;  %s808_s23 = int_to_ptr.hbm [resolvable:$true] %s807_s23 }
  0x31   : > { %s809_s16 = scalar_lea.hbm %s808_s23, 8  ;;  %p815_p5 = scmp.lt.s32.totalorder %s808_s23, %s1175_s1 }
  0x32   : > { %p810_p8 = scmp.ne.s32.totalorder %s808_s23, %s809_s16  ;;  %p816_p11 = scmp.lt.s32.totalorder %s814_s20, %s809_s16 }
  0x34   : > { %p812_p10 = pnand %p810_p8, %p781_p9  ;;  %p817_p2 = por %p816_p11, %p815_p5 }
  0x36   : > { %p813_p12 = pneg %p812_p10 }
  0x38   : > { %p818_p4 = pnand %p817_p2, %p813_p12 }
  0x3a   : > { %821 = shalt.err (!%p818_p4)
}
  0x3b   : > { %698 = dma.hbm_to_vmem [thread:$0]  (!%p1041_p7), %s308_s26, 128, %s310_s30, %s298_s27  }
  0x3c   : > { %318 = sbr.rel (%p990_p3) target bundleno = 549 (0x225), region = 52  ;;  %s1076_s29 = sand.u32 (!%p990_p3), 1, %s903_s28  }
  0x3d   : > { %s1079_s19 = sshll.u32 (!%p990_p3), %s1076_s29, 3  ;;  %s321_s10 = scalar_lea.sflag (!%p990_p3), [#allocation3], %s1076_s29 }
  0x3e   : > { %s324_s17 = scalar_lea.vmem (!%p990_p3), [#allocation2], %s1079_s19 }
  0x41   : > { %882 = dma.done.wait (%p1021_p13), %s321_s10, 128  }
  0x42   : > { %884 = vsyncadd (%p1021_p13), %s321_s10, 4294967168  ;;  %s330_s27 = sand.u32 1, %s985_s12   ;;  %s334_s13 = scalar_lea.vmem [#allocation5], %s1079_s19 }
  0x43   : > { %s331_s30 = scalar_lea.sflag [#allocation6], %s330_s27 }
  0x44   : > { %886 = dma.done.wait (%p1021_p13), %s331_s30, 128  }
  0x45   : > { %888 = vsyncadd (%p1021_p13), %s331_s30, 4294967168 }
  0x46   : > { %890 = dma.done.wait (%p48_p1), [#allocation6], 512  }
  0x47   : > { %892 = vsyncadd (%p48_p1), [#allocation6], 4294966784  ;;  %v383_v0 = vld [vmem:[%s1176_s2 + $0x18] sm:$0xff]  ;;  %v382_v1 = vld [vmem:[%s1176_s2 + $0x10] sm:$0xff]  ;;  %vm388_vm0 = vcmask 261120   ;;  %vm476_vm1 = vcmask 1041408  }
  0x48   : > { %404 = vmatpush.msra.mxu0 %v383_v0  ;;  %v381_v2 = vld [vmem:[%s1176_s2 + $0x8] sm:$0xff]  ;;  %v380_v3 = vld [vmem:[%s1176_s2] sm:$0xff]  ;;  %v448_v5 = vld [vmem:[%s1178_s4 + $0x18] sm:$0xff]  ;;  %vm412_vm2 = vcmask 15360   ;;  %s377_s14 = scalar_lea.vmem [#allocation8], %s1079_s19  ;;  %s857_s19 = scalar_lea.hbm %s1182_s8, 16 }
  0x49   : > { %v378_v4 = vld [vmem:[%s324_s17] sm:$0xff]  ;;  %464 = vmatpush.msra.mxu1 %v448_v5  ;;  %v447_v21 = vld [vmem:[%s1178_s4 + $0x10] sm:$0xff]  ;;  %v511_v42 = vld [vmem:[#allocation7 + $0x18] sm:$0xff]  ;;  %s551_s15 = sshll.u32 %s377_s14, 4  ;;  %s552_s15 = int_to_ptr.vmem [resolvable:$true] %s551_s15 }
  0x4a   : > { %405 = vmatpush.msra.mxu0 %v382_v1  ;;  %v472_v6 = vld [vmem:[%s1181_s7] sm:$0x3]  ;;  %v446_v22 = vld [vmem:[%s1178_s4 + $0x8] sm:$0xff]  ;;  %v379_v26 = vld [vmem:[%s334_s13] sm:$0xff]  ;;  %528 = vmatpush.msra.mxu3 %v511_v42  ;;  %s675_s13 = sshll.u32 %s985_s12, 3  ;;  %s539_s12 = scalar_lea.sflag [#allocation4], %s1076_s29 }
  0x4b   : > { %671 = vmatpush.msk.msra.mxu2 %vm476_vm1, %v472_v6  ;;  %v742_v7 = vld [vmem:[%s1177_s3] ss:$0 sm:$0xff]  ;;  %465 = vmatpush.msra.mxu1 %v447_v21  ;;  %v510_v43 = vld [vmem:[#allocation7 + $0x10] sm:$0xff]  ;;  %v509_v44 = vld [vmem:[#allocation7 + $0x8] sm:$0xff]  ;;  %s549_s23 = scalar_lea.hbm %s1182_s8, %s675_s13 }
  0x4c   : > { %406 = vmatpush.msra.mxu0 %v381_v2  ;;  %v445_v24 = vld [vmem:[%s1178_s4] sm:$0xff]  ;;  %529 = vmatpush.msra.mxu3 %v510_v43  ;;  %s553_s20 = sshll.u32 %s549_s23, 4  ;;  %s554_s20 = int_to_ptr.hbm [resolvable:$true] %s553_s20 }
  0x4d   : > { %466 = vmatpush.msra.mxu1 %v446_v22  ;;  %v508_v45 = vld [vmem:[#allocation7] sm:$0xff]  ;;  %s851_s5 = sshra.s32 %s554_s20, 4  ;;  %s852_s5 = int_to_ptr.hbm [resolvable:$true] %s851_s5 }
  0x4e   : > { %407 = vmatpush.msra.mxu0 %v380_v3  ;;  %530 = vmatpush.msra.mxu3 %v509_v44  ;;  %v512_v56 = vld [vmem:[%s1180_s6] sm:$0x1]  ;;  %s853_s9 = scalar_lea.hbm %s852_s5, 8  ;;  %p858_p7 = scmp.lt.s32.totalorder %s852_s5, %s1182_s8 }
  0x4f   : > { %669 = vmatmul.msk.f32.vlgmr.msra.gmra.mxu0 %vm388_vm0, %v378_v4  ;;  %467 = vmatpush.msra.mxu1 %v445_v24  ;;  %p854_p1 = scmp.ne.s32.totalorder %s852_s5, %s853_s9  ;;  %p859_p9 = scmp.lt.s32.totalorder %s857_s19, %s853_s9 }
  0x50   : > { %670 = vmatmul.msk.f32.vlgmr.msra.gmra.mxu1 %vm388_vm0, %v379_v26  ;;  %531 = vmatpush.msra.mxu3 %v508_v45 }
  0x51   : > { %p855_p3 = pnand %p854_p1, %p1025_p0  ;;  %p860_p8 = por %p859_p9, %p858_p7 }
  0x53   : > { %p856_p13 = pneg %p855_p3 }
  0x55   : > { %p861_p10 = pnand %p860_p8, %p856_p13 }
  0xcc   : > { %v409_v8 = vpop.f32.mrf.mxu0 }
  0xcd   : > { %v410_v9 = vadd.f32 %v742_v7, %v409_v8  ;;  %v469_v46 = vpop.f32.mrf.mxu1 }
  0xcf   : > { %v413_v10 = vsel %vm412_vm2, %v410_v9, -inf }
  0xd0   : > { %v414_v11 = vrot.slane %v413_v10, 4 }
  0xd2   : > { %v415_v12 = vmax.f32 %v413_v10, %v414_v11 }
  0xd4   : > { %v416_v13 = vrot.slane %v415_v12, 2 }
  0xd6   : > { %v417_v14 = vmax.f32 %v415_v12, %v416_v13 }
  0xd8   : > { %v418_v15 = vrot.slane %v417_v14, 1 }
  0xda   : > { %v419_v16 = vmax.f32 %v417_v14, %v418_v15 }
  0xdc   : > { %v420_v17 = vsub.f32 %v410_v9, %v419_v16 }
  0xde   : > { %v421_v18 = vmul.f32 1.442695, %v420_v17 }
  0xe0   : > { %743 = vpow2.f32 %v421_v18 }
  0xe6   : > { %v744_v19 = vpop.eup %743 }
  0xe7   : > { %v423_v20 = vsel %vm412_vm2, %v744_v19, 0.0 }
  0xe8   : > { %v424_v23 = vrot.slane %v423_v20, 4 }
  0xea   : > { %v425_v25 = vadd.f32 %v424_v23, %v423_v20 }
  0xec   : > { %v426_v27 = vrot.slane %v425_v25, 2 }
  0xee   : > { %v427_v28 = vadd.f32 %v426_v27, %v425_v25 }
  0xf0   : > { %v428_v29 = vrot.slane %v427_v28, 1 }
  0xf2   : > { %v429_v30 = vadd.f32 %v428_v29, %v427_v28 }
  0xf4   : > { %745 = vrcp.f32 %v429_v30  ;;  %v441_v34 = vand.u32 2147483648, %v429_v30  ;;  %v439_v36 = vand.u32 2147483647, %v429_v30  ;;  %vm435_vm4 = vweird.f32 %v429_v30 }
  0xf6   : > { %v442_v38 = vor.u32 1.1754944e-38, %v441_v34  ;;  %vm440_vm6 = vcmp.eq.f32.partialorder %v439_v36, 8.507059e+37 }
  0xfa   : > { %v746_v31 = vpop.eup %745 }
  0xfb   : > { %v431_v32 = vmul.f32 %v746_v31, %v429_v30  ;;  %vm436_vm3 = vweird.f32 %v746_v31 }
  0xfc   : > { %vm437_vm5 = vmor %vm435_vm4, %vm436_vm3 }
  0xfd   : > { %v432_v33 = vsub.f32 1.0, %v431_v32 }
  0xff   : > { %v433_v35 = vmul.f32 %v746_v31, %v432_v33 }
 0x101   : > { %v434_v37 = vadd.f32 %v746_v31, %v433_v35 }
 0x103   : > { %v438_v39 = vsel %vm437_vm5, %v746_v31, %v434_v37 }
 0x104   : > { %v443_v40 = vsel %vm440_vm6, %v442_v38, %v438_v39 }
 0x105   : > { %v444_v41 = vmul.f32 %v744_v19, %v443_v40 }
 0x107   : > { %672 = vmatmul.msk.f32.vlgmr.msra.gmra.mxu2 %vm412_vm2, %v444_v41 }
 0x18a   : > { %v497_v47 = vpop.f32.mrf.mxu2 }
 0x18b   : > { %v500_v48 = vmul.f32 %v497_v47, %v469_v46 }
 0x18d   : > { %v501_v49 = vsel %vm388_vm0, %v500_v48, 0.0 }
 0x18e   : > { %v502_v50 = vrot.slane %v501_v49, 4 }
 0x190   : > { %v503_v51 = vadd.f32 %v502_v50, %v501_v49 }
 0x192   : > { %v504_v52 = vrot.slane %v503_v51, 2 }
 0x194   : > { %v505_v53 = vadd.f32 %v504_v52, %v503_v51 }
 0x196   : > { %v506_v54 = vrot.slane %v505_v53, 1 }
 0x198   : > { %v507_v55 = vadd.f32 %v506_v54, %v505_v53 }
 0x19a   : > { %673 = vmatmul.msk.f32.vlgmr.msra.gmra.mxu3 %vm388_vm0, %v507_v55 }
 0x21d   : > { %v533_v57 = vpop.f32.mrf.mxu3 }
 0x21e   : > { %v534_v58 = vadd.f32 %v533_v57, %v512_v56 }
 0x220   : > { %v536_v59 = vperm.slane %v534_v58, 0 }
 0x222   : > { %537 = vst.msk [vmem:[%s377_s14] sm:$0xff] %vm388_vm0, %v536_v59 }
 0x223   : > { %864 = shalt.err (!%p861_p10)
}
 0x224   : > { %686 = dma.vmem_to_hbm [thread:$0]  (%p1025_p0), %s552_s15, 128, %s554_s20, %s539_s12  }
 0x225 PF: > { %s1203_s29 = sld [smem:[#allocation13_spill]] }
 0x226   : > { %s1205_s18 = sld [smem:[#allocation15_spill]] }
 0x22b   : > { %s565_s22 = sand.u32 1, %s1203_s29  }
 0x22c   : > { %p1206_p12 = scmp.ge.s32.totalorder %s1205_s18, 2  ;;  %s566_s13 = scalar_lea.sflag [#allocation4], %s565_s22 }
 0x22e   : > { %p700_p5 = pnand %p1206_p12, %p1031_p6 }
 0x230   : > { %p701_p11 = pneg %p700_p5 }
 0x232   : > { %894 = dma.done.wait (%p701_p11), %s566_s13, 128  }
 0x233   : > { %896 = vsyncadd (%p701_p11), %s566_s13, 4294967168  ;;  %s1207_s30 = sld [smem:[#allocation16_spill]]  ;;  %s1210_s27 = smov %s903_s28 }
 0x234   : > { %s1208_s26 = sld [smem:[#allocation14_spill]] }
 0x235   : > { %s1209_s29 = sld [smem:[#allocation17_spill]] }
 0x239   : > { %p24_p2 = scmp.ge.s32.totalorder %s1207_s30, 4  }
 0x23a   : > { %s1211_s28 = smov %s1208_s26 }
 0x23b   :  { %26 = sbr.rel (!%p24_p2) target bundleno = 9 (0x9), region = 114 }
 0x240   :  { %572 = vsyncpa [#allocation3], 1 }
 0x241   :  { %574 = vsyncpa [#allocation3 + $0x1], 1 }
 0x242   :  { %575 = vsyncpa [#allocation6], 1 }
 0x243   :  { %577 = vsyncpa [#allocation6 + $0x1], 1 }
 0x244   :  { %578 = vsyncpa [#allocation4], 1 }
 0x245   :  { %580 = vsyncpa [#allocation4 + $0x1], 1 }

</bundles_post_ra>
